<compile_context>
chip_gen: v6e
topology: v6e:2x2x1
jax: 0.10.0
libtpu: 0.0.40
codegen_flags: <defaults>
</compile_context>

<pallas_src>
import jax
import jax.numpy as jnp
from jax.experimental import pallas as pl
from jax.experimental.pallas import tpu as pltpu


_LANE = 128
_SUBLANE = 8
# Conservative resident-weight budget: v5e/v6e have 128 MiB VMEM, v7x only 64 MiB
# per TensorCore (and a ~32 MiB default scoped limit), so gate at 48 MiB.
_RESIDENT_VMEM_BUDGET = 48 * 1024 * 1024
_VMEM_LIMIT_CAP = 64 * 1024 * 1024


def _round_up(x, m):
    return (x + m - 1) // m * m


def _pick_tm(batch, block_m=256):
    """Pick the batch tile: prefer >=2 grid steps (v7x megacore) + low pad waste."""
    candidates = [t for t in (512, 256, 128, 64, 32, 16, 8) if t <= max(block_m, 8)]
    best_key, best = None, None
    for t in candidates:
        b_pad = _round_up(max(batch, 1), t)
        steps = b_pad // t
        # padding waste bucketed in ~25% increments of the real batch
        waste_bucket = (b_pad - batch) * 4 // max(batch, 1)
        key = (0 if steps >= 2 else 1, waste_bucket, -t)
        if best_key is None or key < best_key:
            best_key, best = key, (t, b_pad)
    return best


def _fused_linear_kernel(x_ref, w_ref, b_ref, out_ref):
    """One MXU push per tile: out = x @ W_fused + b_eff (f32 accumulation)."""
    acc = jnp.dot(x_ref[...], w_ref[...], preferred_element_type=jnp.float32)
    out_ref[...] = (acc + b_ref[...]).astype(out_ref.dtype)


def prepare_fused_params(params, *, compute_dtype=jnp.bfloat16):
    """Fold the 4 eval-mode linears into one padded weight/bias.

    Call ONCE per parameter set and reuse -- the ~3*N^3 fusion matmuls and the
    lane padding are hoisted out of the per-call forward path.
    # TODO(synk): training-mode dropout would need pltpu.prng_seed /
    # prng_random_bits per layer and would invalidate this algebraic fusion.
    """
    w1, w2, w3, w4 = (params[k].astype(jnp.float32) for k in ("w1", "w2", "w3", "w4"))
    b1, b2, b3, b4 = (params[k].astype(jnp.float32) for k in ("b1", "b2", "b3", "b4"))
    w_fused = w1 @ w2 @ w3 @ w4                                  # [N, N]
    b_eff = ((b1 @ w2 + b2) @ w3 + b3) @ w4 + b4                 # [1, N]

    n = w_fused.shape[0]
    n_pad = _round_up(n, _LANE)                                  # lane-dense feature axis
    # TODO(synk): optional fp8 weight quantization (v7x MXU) would go here.
    w_pad = (jnp.zeros((n_pad, n_pad), compute_dtype)
             .at[:n, :n].set(w_fused.astype(compute_dtype)))
    b_pad = (jnp.zeros((1, n_pad), jnp.float32)
             .at[:, :n].set(b_eff))
    return {"w": w_pad, "b": b_pad}


def encoder_decoder_forward(x, fused, *, out_dtype=None, block_m=256):
    """Forward pass of EncoderDecoderModel (eval mode).

    x: [batch, input_size] array.
    fused: output of prepare_fused_params (padded fused weight/bias).
    out_dtype: output dtype (default x.dtype; pass jnp.bfloat16 to cut HBM
               writeback traffic in the memory-bound regime).
    """
    batch, n_in = x.shape
    w, b = fused["w"], fused["b"]
    n_pad = w.shape[0]
    assert w.shape == (n_pad, n_pad) and b.shape == (1, n_pad)
    assert n_pad == _round_up(n_in, _LANE), "fused params do not match input size"

    compute_dtype = w.dtype                      # bf16 by default (MXU-native)
    out_dtype = out_dtype or x.dtype
    in_isz = jnp.dtype(compute_dtype).itemsize
    out_isz = jnp.dtype(out_dtype).itemsize

    tm, b_pad = _pick_tm(batch, block_m)

    # ---- Pad / cast activations only when actually needed. ----
    x_c = x.astype(compute_dtype)
    padded = (b_pad != batch) or (n_pad != n_in)
    if padded:
        x_c = (jnp.zeros((b_pad, n_pad), compute_dtype)
               .at[:batch, :n_in].set(x_c))

    # ---- Choose weight-resident (1-D grid) vs streamed-weight (2-D grid). ----
    resident_need = (n_pad * n_pad * in_isz          # weight, single-buffered
                     + n_pad * 4                     # bias, single-buffered
                     + 2 * tm * n_pad * in_isz       # x tiles, double-buffered
                     + 2 * tm * n_pad * out_isz)     # out tiles, double-buffered

    if resident_need <= _RESIDENT_VMEM_BUDGET:
        # Path A: fused weight resident in VMEM, 1-D parallel grid over batch.
        grid = (b_pad // tm,)
        in_specs = [
            # x stream (default double-buffering; bump to pl.Buffered(3) only if
            # profiling shows exposed DMA).
            pl.BlockSpec((tm, n_pad), lambda i: (i, 0)),
            # Constant index_map => resident; single buffer halves VMEM cost.
            pl.BlockSpec((n_pad, n_pad), lambda i: (0, 0),
                         pipeline_mode=pl.Buffered(1)),
            pl.BlockSpec((1, n_pad), lambda i: (0, 0),
                         pipeline_mode=pl.Buffered(1)),
        ]
        out_spec = pl.BlockSpec((tm, n_pad), lambda i: (i, 0))
        dim_sem = ("parallel",)
        vmem_need = resident_need
        x_reads = 1
    else:
        # Path B: stream weight column stripes.  Grid = (j: out cols, i: batch);
        # i is the inner axis so each weight stripe is reused across all batch
        # tiles before advancing j.
        tn = 128
        for cand in (4096, 2048, 1024, 512, 256, 128):
            if n_pad % cand != 0:
                continue
            need = (2 * n_pad * cand * in_isz + 2 * cand * 4
                    + 2 * tm * n_pad * in_isz + 2 * tm * cand * out_isz)
            if need <= _RESIDENT_VMEM_BUDGET:
                tn = cand
                break
        grid = (n_pad // tn, b_pad // tm)
        in_specs = [
            pl.BlockSpec((tm, n_pad), lambda j, i: (i, 0)),
            pl.BlockSpec((n_pad, tn), lambda j, i: (0, j)),
            pl.BlockSpec((1, tn), lambda j, i: (0, j)),
        ]
        out_spec = pl.BlockSpec((tm, tn), lambda j, i: (i, j))
        dim_sem = ("parallel", "parallel")
        vmem_need = (2 * n_pad * tn * in_isz + 2 * tn * 4
                     + 2 * tm * n_pad * in_isz + 2 * tm * tn * out_isz)
        x_reads = n_pad // tn

    vmem_limit = int(min(max(vmem_need * 5 // 4 + (1 << 20), 16 * 1024 * 1024),
                         _VMEM_LIMIT_CAP))

    cost = pl.CostEstimate(
        flops=2 * b_pad * n_pad * n_pad,
        transcendentals=0,
        bytes_accessed=int(x_reads * b_pad * n_pad * in_isz     # activations in
                           + n_pad * n_pad * in_isz             # fused weight
                           + n_pad * 4                          # bias (f32)
                           + b_pad * n_pad * out_isz),          # output
    )

    out_pad = pl.pallas_call(
        _fused_linear_kernel,
        out_shape=jax.ShapeDtypeStruct((b_pad, n_pad), out_dtype),
        grid_spec=pltpu.PrefetchScalarGridSpec(
            num_scalar_prefetch=0,
            grid=grid,
            in_specs=in_specs,
            out_specs=out_spec,
        ),
        compiler_params=pltpu.CompilerParams(
            dimension_semantics=dim_sem,
            vmem_limit_bytes=vmem_limit),
        cost_estimate=cost,
    )(x_c, w, b)

    if padded:
        out_pad = out_pad[:batch, :n_in]
    return out_pad


def init_params(key, input_size, dtype=jnp.float32):
    """Deterministic init mimicking nn.Linear default (U[-1/sqrt(fan_in), +])."""
    d_in = input_size
    d_3q = input_size * 3 // 4
    d_half = input_size // 2

    dims = [
        ("w1", "b1", d_in, d_3q),     # encoder_1
        ("w2", "b2", d_3q, d_half),   # encoder_2
        ("w3", "b3", d_half, d_3q),   # decoder_1
        ("w4", "b4", d_3q, d_in),     # decoder_2
    ]
    params = {}
    for wname, bname, fan_in, fan_out in dims:
        key, kw, kb = jax.random.split(key, 3)
        bound = 1.0 / jnp.sqrt(jnp.asarray(fan_in, jnp.float32))
        # stored [in, out]; biases [1, out] for TPU 2-D friendliness
        params[wname] = jax.random.uniform(
            kw, (fan_in, fan_out), dtype, -bound, bound)
        params[bname] = jax.random.uniform(
            kb, (1, fan_out), dtype, -bound, bound)
    return params


def reference_forward(x, params):
    """Pure-JAX sequential reference (eval-mode dropout == identity)."""
    h = x @ params["w1"] + params["b1"]
    h = h @ params["w2"] + params["b2"]
    h = h @ params["w3"] + params["b3"]
    h = h @ params["w4"] + params["b4"]
    return h


if __name__ == "__main__":
    batch = 8
    input_size = 32  # -> hidden layers of 24 and 16 features

    key = jax.random.PRNGKey(0)
    key, kx = jax.random.split(key)
    x = jax.random.normal(kx, (batch, input_size), jnp.float32)

    params = init_params(key, input_size)
    ref = reference_forward(x, params)

    fwd = jax.jit(encoder_decoder_forward)

    # --- Precise check: f32 MXU inputs, tight tolerance (fusion only re-orders FP). ---
    fused_f32 = prepare_fused_params(params, compute_dtype=jnp.float32)
    out_f32 = jax.block_until_ready(fwd(x, fused_f32))
    assert out_f32.shape == (batch, input_size)
    assert jnp.allclose(out_f32, ref, atol=1e-4, rtol=1e-4), "f32 path mismatch"

    # --- Default fast path: bf16 MXU inputs, dtype-aware tolerance. ---
    fused_bf16 = prepare_fused_params(params)  # compute_dtype=bfloat16
    out_bf16 = jax.block_until_ready(fwd(x, fused_bf16))
    assert out_bf16.shape == (batch, input_size)
    assert out_bf16.dtype == x.dtype
    assert jnp.allclose(out_bf16, ref, atol=5e-2, rtol=5e-2), "bf16 path mismatch"

    print("KERNEL_OK")
</pallas_src>

<mosaic_0001>
module attributes {stable_mosaic.version = 11 : i64} {
  func.func @_fused_linear_kernel(%arg0: i32, %arg1: memref<8x128xf32, #tpu.memory_space<vmem>>, %arg2: memref<128x128xf32, #tpu.memory_space<vmem>>, %arg3: memref<1x128xf32, #tpu.memory_space<vmem>>, %arg4: memref<8x128xf32, #tpu.memory_space<vmem>>) attributes {dimension_semantics = [#tpu.dimension_semantics<parallel>], iteration_bounds = array<i64: 1>, scalar_prefetch = 0 : i64, scratch_operands = 0 : i64, tpu.core_type = #tpu.core_type<tc>, window_params = [{transform_indices = @transform_0, window_bounds = array<i64: 8, 128>}, {pipeline_mode = #tpu.pipeline_mode<synchronous>, transform_indices = @transform_1, window_bounds = array<i64: 128, 128>}, {pipeline_mode = #tpu.pipeline_mode<synchronous>, transform_indices = @transform_2, window_bounds = array<i64: 1, 128>}, {transform_indices = @transform_3, window_bounds = array<i64: 8, 128>}]} {
    %c0 = arith.constant 0 : index
    %c0_0 = arith.constant 0 : index
    %0 = vector.load %arg1[%c0, %c0_0] : memref<8x128xf32, #tpu.memory_space<vmem>>, vector<8x128xf32>
    %c0_1 = arith.constant 0 : index
    %c0_2 = arith.constant 0 : index
    %1 = vector.load %arg2[%c0_1, %c0_2] : memref<128x128xf32, #tpu.memory_space<vmem>>, vector<128x128xf32>
    %cst = arith.constant dense<0.000000e+00> : vector<8x128xf32>
    %2 = tpu.matmul %0, %1, %cst {dimension_numbers = #tpu.dot_dimension_numbers<[1], [0], [0], [1], [0, 0, 1, 1], [], []>} : vector<8x128xf32>, vector<128x128xf32>, vector<8x128xf32> -> vector<8x128xf32>
    %c0_3 = arith.constant 0 : index
    %c0_4 = arith.constant 0 : index
    %3 = vector.load %arg3[%c0_3, %c0_4] : memref<1x128xf32, #tpu.memory_space<vmem>>, vector<1x128xf32>
    %4 = vector.broadcast %3 : vector<1x128xf32> to vector<8x128xf32>
    %5 = arith.addf %2, %4 : vector<8x128xf32>
    %c0_5 = arith.constant 0 : index
    %c0_6 = arith.constant 0 : index
    %6 = vector.load %arg4[%c0_5, %c0_6] : memref<8x128xf32, #tpu.memory_space<vmem>>, vector<8x128xf32>
    tpu.vector_store %arg4[%c0_5, %c0_6], %5 {strides = array<i32>} : memref<8x128xf32, #tpu.memory_space<vmem>>, vector<8x128xf32>,
    return
  }
  func.func @transform_0(%arg0: i32) -> (i32, i32) {
    %c0_i32 = arith.constant 0 : i32
    %c0_i32_0 = arith.constant 0 : i32
    return %arg0, %c0_i32 : i32, i32
  }
  func.func @transform_1(%arg0: i32) -> (i32, i32) {
    %c0_i32 = arith.constant 0 : i32
    %c0_i32_0 = arith.constant 0 : i32
    %c0_i32_1 = arith.constant 0 : i32
    return %c0_i32, %c0_i32_0 : i32, i32
  }
  func.func @transform_2(%arg0: i32) -> (i32, i32) {
    %c0_i32 = arith.constant 0 : i32
    %c0_i32_0 = arith.constant 0 : i32
    %c0_i32_1 = arith.constant 0 : i32
    return %c0_i32, %c0_i32_0 : i32, i32
  }
  func.func @transform_3(%arg0: i32) -> (i32, i32) {
    %c0_i32 = arith.constant 0 : i32
    %c0_i32_0 = arith.constant 0 : i32
    return %arg0, %c0_i32 : i32, i32
  }
}

</mosaic_0001>

<bundles_post_ra>
// kernel: encoder_decoder_forward.1
= control target key start
LH: loop header
LB: loop body
LE: loop exit
PB: predicated region body
PF: predicated region fallthrough
CT: control target
= control target key end

     0   :  { %8 = vsyncpa [#allocation3], 0  ;;  %s280_s0 = inlined_call_operand.vmem [shape: f32[8,128], index: 0, kind: input, shape index: {}]   ;;  %s281_s1 = inlined_call_operand.hbm [shape: f32[128,128], index: 1, kind: input, shape index: {}]   ;;  %s282_s2 = inlined_call_operand.vmem [shape: f32[1,128], index: 2, kind: input, shape index: {}]   ;;  %s283_s3 = inlined_call_operand.hbm [shape: f32[8,128], index: 3, kind: output, shape index: {}]  }
   0x1   :  { %9 = vsyncpa [#allocation4], 0  ;;  %s242_s12 = smov [#allocation2]  }
   0x2   :  { %s17_s13 = sshll.u32 %s242_s12, 4  ;;  %s18_s13 = int_to_ptr.vmem [resolvable:$true] %s17_s13 }
   0x3   :  { %s206_s14 = scalar_lea.vmem %s18_s13, 2048  ;;  %p211_p1 = scmp.lt.s32.totalorder %s18_s13, %s18_s13 }
   0x4   :  { %p207_p0 = scmp.ne.s32.totalorder %s18_s13, %s206_s14  ;;  %p212_p2 = scmp.lt.s32.totalorder %s206_s14, %s206_s14 }
   0x6   :  { %p213_p3 = por %p212_p2, %p211_p1 }
   0x8   :  { %p214_p4 = pnand %p213_p3, %p207_p0 }
   0xa   :  { %217 = shalt.err (!%p214_p4)
}
   0xb   :  { %s243_s15 = smov 128   ;;  %s244_s16 = smov 8  }
   0xc   :  { %23 = dma.hbm_to_vmem [thread:$0]  %s281_s1, 2048, %s18_s13, [#allocation3], %s243_s15, %s243_s15, %s244_s16  }
   0xd   :  { %238 = dma.done.wait [#allocation3], 2048  }
   0xe   :  { %239 = vsyncadd [#allocation3], 4294965248  ;;  %v245_v0 = vmov 0.0   ;;  %vm246_vm0 = vmmov 0   ;;  %v45_v1 = vld [vmem:[#allocation2 + $0x78] sm:$0xff]  ;;  %v44_v2 = vld [vmem:[#allocation2 + $0x70] sm:$0xff] }
   0xf   :  { %157 = vmatprep.subr.mxu0 %v245_v0  ;;  %189 = vmatprep.mubr.msk.f32.mxu0 %vm246_vm0, %v245_v0  ;;  %v43_v3 = vld [vmem:[#allocation2 + $0x68] sm:$0xff]  ;;  %v42_v4 = vld [vmem:[#allocation2 + $0x60] sm:$0xff]  ;;  %v41_v5 = vld [vmem:[#allocation2 + $0x58] sm:$0xff]  ;;  %s247_s22 = smov [#allocation5]  }
  0x10   :  { %158 = vmatpush3.msra.mxu0 %v45_v1  ;;  %v40_v6 = vld [vmem:[#allocation2 + $0x50] sm:$0xff]  ;;  %v39_v7 = vld [vmem:[#allocation2 + $0x48] sm:$0xff]  ;;  %v38_v8 = vld [vmem:[#allocation2 + $0x40] sm:$0xff]  ;;  %s130_s23 = sshll.u32 %s247_s22, 4  ;;  %s131_s23 = int_to_ptr.vmem [resolvable:$true] %s130_s23 }
  0x11   :  { %159 = vmatprep.subr.mxu0 %v245_v0  ;;  %v37_v9 = vld [vmem:[#allocation2 + $0x38] sm:$0xff]  ;;  %v36_v10 = vld [vmem:[#allocation2 + $0x30] sm:$0xff]  ;;  %v35_v11 = vld [vmem:[#allocation2 + $0x28] sm:$0xff]  ;;  %s218_s24 = scalar_lea.vmem %s131_s23, 128  ;;  %p223_p6 = scmp.lt.s32.totalorder %s131_s23, %s131_s23 }
  0x12   :  { %160 = vmatpush3.msra.mxu0 %v44_v2  ;;  %v34_v12 = vld [vmem:[#allocation2 + $0x20] sm:$0xff]  ;;  %v33_v13 = vld [vmem:[#allocation2 + $0x18] sm:$0xff]  ;;  %v32_v14 = vld [vmem:[#allocation2 + $0x10] sm:$0xff]  ;;  %p219_p5 = scmp.ne.s32.totalorder %s131_s23, %s218_s24  ;;  %p224_p7 = scmp.lt.s32.totalorder %s218_s24, %s218_s24 }
  0x13   :  { %161 = vmatprep.subr.mxu0 %v245_v0  ;;  %v31_v15 = vld [vmem:[#allocation2 + $0x8] sm:$0xff]  ;;  %v30_v16 = vld [vmem:[#allocation2] sm:$0xff] }
  0x14   :  { %162 = vmatpush3.msra.mxu0 %v43_v3  ;;  %v29_v17 = vld [vmem:[%s280_s0] sm:$0xff]  ;;  %p225_p8 = por %p224_p7, %p223_p6 }
  0x15   :  { %163 = vmatprep.subr.mxu0 %v245_v0  ;;  %v139_v18 = vld [vmem:[%s282_s2] ss:$0 sm:$0xff] }
  0x16   :  { %164 = vmatpush3.msra.mxu0 %v42_v4  ;;  %p226_p9 = pnand %p225_p8, %p219_p5 }
  0x17   :  { %165 = vmatprep.subr.mxu0 %v245_v0 }
  0x18   :  { %166 = vmatpush3.msra.mxu0 %v41_v5 }
  0x19   :  { %167 = vmatprep.subr.mxu0 %v245_v0 }
  0x1a   :  { %168 = vmatpush3.msra.mxu0 %v40_v6 }
  0x1b   :  { %169 = vmatprep.subr.mxu0 %v245_v0 }
  0x1c   :  { %170 = vmatpush3.msra.mxu0 %v39_v7 }
  0x1d   :  { %171 = vmatprep.subr.mxu0 %v245_v0 }
  0x1e   :  { %172 = vmatpush3.msra.mxu0 %v38_v8 }
  0x1f   :  { %173 = vmatprep.subr.mxu0 %v245_v0 }
  0x20   :  { %174 = vmatpush3.msra.mxu0 %v37_v9 }
  0x21   :  { %175 = vmatprep.subr.mxu0 %v245_v0 }
  0x22   :  { %176 = vmatpush3.msra.mxu0 %v36_v10 }
  0x23   :  { %177 = vmatprep.subr.mxu0 %v245_v0 }
  0x24   :  { %178 = vmatpush3.msra.mxu0 %v35_v11 }
  0x25   :  { %179 = vmatprep.subr.mxu0 %v245_v0 }
  0x26   :  { %180 = vmatpush3.msra.mxu0 %v34_v12 }
  0x27   :  { %181 = vmatprep.subr.mxu0 %v245_v0 }
  0x28   :  { %182 = vmatpush3.msra.mxu0 %v33_v13 }
  0x29   :  { %183 = vmatprep.subr.mxu0 %v245_v0 }
  0x2a   :  { %184 = vmatpush3.msra.mxu0 %v32_v14 }
  0x2b   :  { %185 = vmatprep.subr.mxu0 %v245_v0 }
  0x2c   :  { %186 = vmatpush3.msra.mxu0 %v31_v15 }
  0x2d   :  { %187 = vmatprep.subr.mxu0 %v245_v0 }
  0x2e   :  { %188 = vmatpush3.msra.mxu0 %v30_v16 }
  0x2f   :  { %190 = vmatmul.mubr.f32.vlgmr.msra.gmra.mxu0 %v29_v17 }
  0xef   :  { %v119_v19 = vpop.f32.mrf.mxu0 }
  0xf0   :  { %v120_v20 = vadd.f32 %v139_v18, %v119_v19 }
  0xf1   :  { %v191_v21 = vpop.f32.mrf.mxu0 }
  0xf2   :  { %123 = vst [vmem:[#allocation5] sm:$0xff] %v120_v20 }
  0xf3   :  { %229 = shalt.err (!%p226_p9)
}
  0xf4   :  { %133 = dma.vmem_to_hbm [thread:$0]  %s131_s23, 128, %s283_s3, [#allocation4]  }
  0xf5   :  { %240 = dma.done.wait [#allocation4], 128  }
  0xf6   :  { %241 = vsyncadd [#allocation4], 4294967168 }
  0xf7   :  { %137 = vsyncpa [#allocation3], 1 }
  0xf8   :  { %138 = vsyncpa [#allocation4], 1 }

</bundles_post_ra>
